<compile_context>
chip_gen: v6e
topology: v6e:2x2x1
jax: 0.10.0
libtpu: 0.0.40
codegen_flags: <defaults>
</compile_context>

<pallas_src>
import functools

import jax
import jax.numpy as jnp
from jax.experimental import pallas as pl
from jax.experimental.pallas import tpu as pltpu


def _round_up(x: int, m: int) -> int:
    return (x + m - 1) // m * m


def _linear_kernel(x_ref, w_ref, b_ref, o_ref):
    # x_ref: (TM, K) VMEM tile of activations for this grid step.
    # w_ref: (K, N_pad)  -- constant index_map, resident across all M tiles.
    # b_ref: (1, N_pad)  -- constant index_map, resident across all M tiles.
    # o_ref: (TM, N_pad) -- lane-dense (N_pad multiple of 128) => unmasked vst.
    acc = jnp.dot(x_ref[...], w_ref[...], preferred_element_type=jnp.float32)
    o_ref[...] = (acc + b_ref[...].astype(jnp.float32)).astype(o_ref.dtype)


@functools.partial(jax.jit, static_argnames=("tm_max",))
def pallas_linear(x2d, w_pad, b_pad, *, tm_max: int = 512):
    """y_pad = x2d @ w_pad + b_pad via a Pallas kernel tiled over rows.

    x2d:   (M, K) f32 activations (M = batch*seq, K = in_features).
    w_pad: (K, N_pad) f32 weight, N_pad a multiple of 128 (lane-dense).
    b_pad: (1, N_pad) f32 bias.
    Returns (M_pad, N_pad); caller slices [:M, :N].
    """
    M, K = x2d.shape
    Kw, Np = w_pad.shape
    assert K == Kw
    assert Np % 128 == 0

    # Row tile: multiple of 8 (sublane), capped at tm_max; pad M so the grid
    # divides evenly (padded rows compute bias-only garbage, sliced off later).
    tm = min(_round_up(tm_max, 8), _round_up(M, 8))
    m_pad = _round_up(M, tm)
    if m_pad != M:
        x2d = jnp.pad(x2d, ((0, m_pad - M), (0, 0)))

    grid = (m_pad // tm,)

    return pl.pallas_call(
        _linear_kernel,
        out_shape=jax.ShapeDtypeStruct((m_pad, Np), x2d.dtype),
        grid_spec=pl.GridSpec(
            grid=grid,
            in_specs=[
                # Activations: one (tm, K) tile per grid step (K full-extent).
                pl.BlockSpec((tm, K), lambda i: (i, 0)),
                # Weight: constant block index -> fetched once, kept resident.
                pl.BlockSpec((K, Np), lambda i: (0, 0)),
                # Bias: constant block index -> fetched once, kept resident.
                pl.BlockSpec((1, Np), lambda i: (0, 0)),
            ],
            out_specs=pl.BlockSpec((tm, Np), lambda i: (i, 0)),
        ),
        compiler_params=pltpu.CompilerParams(
            # Independent M tiles: shard across the 2 TensorCores on v7x,
            # no-op on v5e/v6e.
            dimension_semantics=("parallel",),
            # Well under v7x's 64 MiB physical VMEM even with double-buffering
            # (tile footprint at tm=512, Np=128 is < 1 MiB).
            vmem_limit_bytes=32 * 1024 * 1024,
        ),
    )(x2d, w_pad, b_pad)


class PallasPaddleModule:
    """JAX/Pallas equivalent of PaddleModule wrapping paddle.nn.Linear(H, H)."""

    def __init__(self, name, hidden_in, hidden_out, key):
        self.name = name
        self.in_features = hidden_in
        self.out_features = hidden_out
        kw, kb = jax.random.split(key)
        # paddle.nn.Linear weight layout is [in_features, out_features].
        self.weight = (
            jax.random.normal(kw, (hidden_in, hidden_out), jnp.float32) * 0.02
        )
        self.bias = jax.random.normal(kb, (hidden_out,), jnp.float32) * 0.02

        # Pad the output dim once at init to a lane-dense multiple of 128 so
        # the kernel's stores are unmasked full-lane vst; sliced in forward().
        n_pad = _round_up(hidden_out, 128)
        self._w_pad = jnp.pad(
            self.weight, ((0, 0), (0, n_pad - hidden_out))
        )
        self._b_pad = jnp.pad(
            self.bias, (0, n_pad - hidden_out)
        ).reshape(1, n_pad)

    def forward(self, x):
        # to_pd_tensors / to_pt_tensors are identity under JAX.
        B, S, H = x.shape
        assert H == self.in_features
        x2d = x.reshape(B * S, H)
        y_pad = pallas_linear(x2d, self._w_pad, self._b_pad)
        y2d = y_pad[: B * S, : self.out_features]
        return y2d.reshape(B, S, self.out_features)

    def get_parameters(self):
        return [self.weight, self.bias]


if __name__ == "__main__":
    key = jax.random.PRNGKey(0)
    k_in, k_mod = jax.random.split(key)

    batch, seq, hidden = 2, 8, 32
    x = jax.random.normal(k_in, (batch, seq, hidden), jnp.float32)

    mod = PallasPaddleModule("paddle_linear", hidden, hidden, k_mod)
    out = mod.forward(x)
    out = jax.block_until_ready(out)

    # Reference check (plain JAX) for the wrapped layer's forward.
    ref = x.reshape(-1, hidden) @ mod.weight + mod.bias
    ref = ref.reshape(batch, seq, hidden)
    assert out.shape == (batch, seq, hidden)
    assert jnp.allclose(out, ref, atol=1e-5, rtol=1e-5)

    # Also exercise a larger batch to confirm the M-tiled grid path
    # (multiple grid steps, padded M) stays correct.
    x_big = jax.random.normal(jax.random.PRNGKey(1), (4, 300, hidden), jnp.float32)
    out_big = jax.block_until_ready(mod.forward(x_big))
    ref_big = (x_big.reshape(-1, hidden) @ mod.weight + mod.bias).reshape(4, 300, hidden)
    assert jnp.allclose(out_big, ref_big, atol=1e-5, rtol=1e-5)

    print("KERNEL_OK")
</pallas_src>

<mosaic_0001>
module attributes {stable_mosaic.version = 11 : i64} {
  func.func @_linear_kernel(%arg0: i32, %arg1: memref<16x32xf32, #tpu.memory_space<vmem>>, %arg2: memref<32x128xf32, #tpu.memory_space<vmem>>, %arg3: memref<1x128xf32, #tpu.memory_space<vmem>>, %arg4: memref<16x128xf32, #tpu.memory_space<vmem>>) attributes {dimension_semantics = [#tpu.dimension_semantics<parallel>], iteration_bounds = array<i64: 1>, scalar_prefetch = 0 : i64, scratch_operands = 0 : i64, tpu.core_type = #tpu.core_type<tc>, window_params = [{transform_indices = @transform_0, window_bounds = array<i64: 16, 32>}, {pipeline_mode = #tpu.pipeline_mode<synchronous>, transform_indices = @transform_1, window_bounds = array<i64: 32, 128>}, {pipeline_mode = #tpu.pipeline_mode<synchronous>, transform_indices = @transform_2, window_bounds = array<i64: 1, 128>}, {transform_indices = @transform_3, window_bounds = array<i64: 16, 128>}]} {
    %c0 = arith.constant 0 : index
    %c0_0 = arith.constant 0 : index
    %0 = vector.load %arg1[%c0, %c0_0] : memref<16x32xf32, #tpu.memory_space<vmem>>, vector<16x32xf32>
    %c0_1 = arith.constant 0 : index
    %c0_2 = arith.constant 0 : index
    %1 = vector.load %arg2[%c0_1, %c0_2] : memref<32x128xf32, #tpu.memory_space<vmem>>, vector<32x128xf32>
    %cst = arith.constant dense<0.000000e+00> : vector<16x128xf32>
    %2 = tpu.matmul %0, %1, %cst {dimension_numbers = #tpu.dot_dimension_numbers<[1], [0], [0], [1], [0, 0, 1, 1], [], []>} : vector<16x32xf32>, vector<32x128xf32>, vector<16x128xf32> -> vector<16x128xf32>
    %c0_3 = arith.constant 0 : index
    %c0_4 = arith.constant 0 : index
    %3 = vector.load %arg3[%c0_3, %c0_4] : memref<1x128xf32, #tpu.memory_space<vmem>>, vector<1x128xf32>
    %4 = vector.broadcast %3 : vector<1x128xf32> to vector<16x128xf32>
    %5 = arith.addf %2, %4 : vector<16x128xf32>
    %c0_5 = arith.constant 0 : index
    %c0_6 = arith.constant 0 : index
    %6 = vector.load %arg4[%c0_5, %c0_6] : memref<16x128xf32, #tpu.memory_space<vmem>>, vector<16x128xf32>
    tpu.vector_store %arg4[%c0_5, %c0_6], %5 {strides = array<i32>} : memref<16x128xf32, #tpu.memory_space<vmem>>, vector<16x128xf32>,
    return
  }
  func.func @transform_0(%arg0: i32) -> (i32, i32) {
    %c0_i32 = arith.constant 0 : i32
    %c0_i32_0 = arith.constant 0 : i32
    return %arg0, %c0_i32 : i32, i32
  }
  func.func @transform_1(%arg0: i32) -> (i32, i32) {
    %c0_i32 = arith.constant 0 : i32
    %c0_i32_0 = arith.constant 0 : i32
    %c0_i32_1 = arith.constant 0 : i32
    return %c0_i32, %c0_i32_0 : i32, i32
  }
  func.func @transform_2(%arg0: i32) -> (i32, i32) {
    %c0_i32 = arith.constant 0 : i32
    %c0_i32_0 = arith.constant 0 : i32
    %c0_i32_1 = arith.constant 0 : i32
    return %c0_i32, %c0_i32_0 : i32, i32
  }
  func.func @transform_3(%arg0: i32) -> (i32, i32) {
    %c0_i32 = arith.constant 0 : i32
    %c0_i32_0 = arith.constant 0 : i32
    return %arg0, %c0_i32 : i32, i32
  }
}

</mosaic_0001>

<bundles_post_ra>
// kernel: pallas_linear.1
= control target key start
LH: loop header
LB: loop body
LE: loop exit
PB: predicated region body
PF: predicated region fallthrough
CT: control target
= control target key end

     0   :  { %8 = vsyncpa [#allocation3], 0  ;;  %s297_s0 = inlined_call_operand.hbm [shape: f32[16,32], index: 0, kind: input, shape index: {}]   ;;  %s298_s1 = inlined_call_operand.hbm [shape: f32[32,128], index: 1, kind: input, shape index: {}]   ;;  %s299_s2 = inlined_call_operand.vmem [shape: f32[1,128], index: 2, kind: input, shape index: {}]   ;;  %s300_s3 = inlined_call_operand.hbm [shape: f32[16,128], index: 3, kind: output, shape index: {}]  }
   0x1   :  { %9 = vsyncpa [#allocation6], 0 }
   0x2   :  { %10 = vsyncpa [#allocation4], 0  ;;  %s249_s12 = smov [#allocation2]  }
   0x3   :  { %s16_s13 = sshll.u32 %s249_s12, 4  ;;  %s17_s13 = int_to_ptr.vmem [resolvable:$true] %s16_s13 }
   0x4   :  { %s191_s14 = scalar_lea.vmem %s17_s13, 256  ;;  %p196_p1 = scmp.lt.s32.totalorder %s17_s13, %s17_s13 }
   0x5   :  { %p192_p0 = scmp.ne.s32.totalorder %s17_s13, %s191_s14  ;;  %p197_p2 = scmp.lt.s32.totalorder %s191_s14, %s191_s14 }
   0x7   :  { %p198_p3 = por %p197_p2, %p196_p1 }
   0x9   :  { %p199_p4 = pnand %p198_p3, %p192_p0 }
   0xb   :  { %202 = shalt.err (!%p199_p4)
}
   0xc   :  { %s250_s15 = smov 128   ;;  %s251_s16 = smov 8  }
   0xd   :  { %22 = dma.hbm_to_vmem [thread:$0]  %s297_s0, 256, %s17_s13, [#allocation3], %s250_s15, %s250_s15, %s251_s16  }
   0xe   :  { %s252_s19 = smov [#allocation5]  }
   0xf   :  { %s28_s20 = sshll.u32 %s252_s19, 4  ;;  %s29_s20 = int_to_ptr.vmem [resolvable:$true] %s28_s20 }
  0x10   :  { %s211_s21 = scalar_lea.vmem %s29_s20, 512  ;;  %p216_p6 = scmp.lt.s32.totalorder %s29_s20, %s29_s20 }
  0x11   :  { %p212_p5 = scmp.ne.s32.totalorder %s29_s20, %s211_s21  ;;  %p217_p7 = scmp.lt.s32.totalorder %s211_s21, %s211_s21 }
  0x13   :  { %p218_p8 = por %p217_p7, %p216_p6 }
  0x15   :  { %p219_p9 = pnand %p218_p8, %p212_p5 }
  0x17   :  { %222 = shalt.err (!%p219_p9)
}
  0x18   :  { %34 = dma.hbm_to_vmem [thread:$0]  %s298_s1, 512, %s29_s20, [#allocation6], %s250_s15, %s250_s15, %s251_s16  }
  0x19   :  { %243 = dma.done.wait [#allocation3], 256  }
  0x1a   :  { %244 = vsyncadd [#allocation3], 4294967040 }
  0x1b   :  { %245 = dma.done.wait [#allocation6], 512  }
  0x1c   :  { %246 = vsyncadd [#allocation6], 4294966784  ;;  %vm56_vm0 = vcmask 261120   ;;  %v48_v0 = vld [vmem:[#allocation5 + $0x18] sm:$0xff]  ;;  %v47_v1 = vld [vmem:[#allocation5 + $0x10] sm:$0xff]  ;;  %s253_s24 = smov [#allocation7]  }
  0x1d   :  { %167 = vmatprep.subr.mxu0 %v48_v0  ;;  %v43_v2 = vld [vmem:[#allocation2] sm:$0xff]  ;;  %v46_v3 = vld [vmem:[#allocation5 + $0x8] sm:$0xff]  ;;  %v45_v4 = vld [vmem:[#allocation5] sm:$0xff]  ;;  %s145_s25 = sshll.u32 %s253_s24, 4  ;;  %s146_s25 = int_to_ptr.vmem [resolvable:$true] %s145_s25 }
  0x1e   :  { %168 = vmatpush3.msra.mxu0 %v48_v0  ;;  %175 = vmatprep.mubr.msk.f32.mxu0 %vm56_vm0, %v43_v2  ;;  %v44_v5 = vld [vmem:[#allocation2 + $0x8] sm:$0xff]  ;;  %v158_v6 = vld [vmem:[%s299_s2] ss:$0 sm:$0xff]  ;;  %s223_s26 = scalar_lea.vmem %s146_s25, 256  ;;  %p228_p11 = scmp.lt.s32.totalorder %s146_s25, %s146_s25 }
  0x1f   :  { %169 = vmatprep.subr.mxu0 %v47_v1  ;;  %p224_p10 = scmp.ne.s32.totalorder %s146_s25, %s223_s26  ;;  %p229_p12 = scmp.lt.s32.totalorder %s223_s26, %s223_s26 }
  0x20   :  { %170 = vmatpush3.msra.mxu0 %v47_v1 }
  0x21   :  { %171 = vmatprep.subr.mxu0 %v46_v3  ;;  %p230_p13 = por %p229_p12, %p228_p11 }
  0x22   :  { %172 = vmatpush3.msra.mxu0 %v46_v3 }
  0x23   :  { %173 = vmatprep.subr.mxu0 %v45_v4  ;;  %p231_p0 = pnand %p230_p13, %p224_p10 }
  0x24   :  { %174 = vmatpush3.msra.mxu0 %v45_v4 }
  0x25   :  { %176 = vmatmul.mubr.msk.f32.vlgmr.msra.gmra.mxu0 %vm56_vm0, %v44_v5 }
  0xe5   :  { %v177_v7 = vpop.f32.mrf.mxu0 }
  0xe6   :  { %v135_v8 = vadd.f32 %v177_v7, %v158_v6 }
  0xe7   :  { %v129_v9 = vpop.f32.mrf.mxu0 }
  0xe8   :  { %139 = vst [vmem:[#allocation7 + $0x8] sm:$0xff] %v135_v8  ;;  %v130_v10 = vadd.f32 %v158_v6, %v129_v9 }
  0xea   :  { %138 = vst [vmem:[#allocation7] sm:$0xff] %v130_v10 }
  0xeb   :  { %234 = shalt.err (!%p231_p0)
}
  0xec   :  { %151 = dma.vmem_to_hbm [thread:$0]  %s146_s25, 256, %s300_s3, [#allocation4], %s250_s15, %s250_s15, %s251_s16  }
  0xed   :  { %247 = dma.done.wait [#allocation4], 256  }
  0xee   :  { %248 = vsyncadd [#allocation4], 4294967040 }
  0xef   :  { %155 = vsyncpa [#allocation3], 1 }
  0xf0   :  { %156 = vsyncpa [#allocation6], 1 }
  0xf1   :  { %157 = vsyncpa [#allocation4], 1 }

</bundles_post_ra>
